<compile_context>
chip_gen: v5e
topology: v5e:2x2
jax: 0.10.0
libtpu: 0.0.40
codegen_flags: <defaults>
</compile_context>

<pallas_src>
import jax
import jax.numpy as jnp
from jax import lax
from jax.experimental import pallas as pl
from jax.experimental.pallas import tpu as pltpu


def pack_params(emb_w, w_ih, w_hh, b_ih, b_hh, w_fc, b_fc):
    """Build the single (rows, 128) f32 parameter slab.

    Row layout (H=hidden, V=vocab/embedding, O=output):
      rows [0:H)      cols [0:H+O)  : W_cat = [W_hh^T | W_fc^T]      (H, H+O)
      rows [H:H+V)    cols [0:H)    : fused = E @ W_ih^T             (V, H)
      row  H+V        cols [0:H)    : b_ih + b_hh                    (H,)
      row  H+V+1      cols [0:O)    : b_fc                           (O,)
    In a real deployment this slab is computed once and cached with the params.
    """
    V = emb_w.shape[0]
    H = w_hh.shape[0]
    O = w_fc.shape[0]
    fused = jnp.dot(emb_w.astype(jnp.float32), w_ih.T.astype(jnp.float32),
                    precision=lax.Precision.HIGHEST)                 # (V, H)
    w_cat = jnp.concatenate([w_hh.T, w_fc.T], axis=1).astype(jnp.float32)  # (H, H+O)
    rows = H + V + 2
    rows_pad = -(-rows // 8) * 8
    slab = jnp.zeros((rows_pad, 128), jnp.float32)
    slab = slab.at[0:H, 0:H + O].set(w_cat)
    slab = slab.at[H:H + V, 0:H].set(fused)
    slab = slab.at[H + V, 0:H].set((b_ih + b_hh).astype(jnp.float32))
    slab = slab.at[H + V + 1, 0:O].set(b_fc.astype(jnp.float32))
    return slab


def make_kernel(B, S, V, H, O):
    def kernel(x_ref, p_ref, out_ref):
        # x_ref: (S*B, V) time-major flattened one-hot rows; row r = s*B + b.
        x = x_ref[...]                                          # (S*B, V)

        # --- argmax(dim=-1) reproduced as a strict one-hot selector (first max
        #     wins, matching torch.argmax / jnp.argmax tie-breaking).
        #     NOTE: NaN lanes would differ from torch (sel all-zero) -- irrelevant
        #     for strict one-hot inputs. ---
        iota = lax.broadcasted_iota(jnp.int32, x.shape, 1)
        xmax = jnp.max(x, axis=-1, keepdims=True)
        masked = jnp.where(x == xmax, iota, V)                  # non-max -> sentinel
        first_idx = jnp.min(masked, axis=-1, keepdims=True)
        sel = (iota == first_idx).astype(jnp.float32)           # (S*B, V) one-hot

        # --- static sub-slices of the single parameter slab ---
        w_cat = p_ref[0:H, 0:H + O]                             # (H, H+O) [Whh^T|Wfc^T]
        fused = p_ref[H:H + V, 0:H]                             # (V, H)   E @ Wih^T
        bias = p_ref[H + V:H + V + 1, 0:H]                      # (1, H)   b_ih + b_hh
        bfc = p_ref[H + V + 1:H + V + 2, 0:O]                   # (1, O)   fc bias

        # --- hoisted input projection + combined biases (sel is exact 0/1, so
        #     this is an exact row gather of `fused`). ---
        xp = jnp.dot(sel, fused, preferred_element_type=jnp.float32) + bias  # (S*B, H)
        # Pre-extract per-step operands (off the h->h critical path).
        xp_t = [xp[t * B:(t + 1) * B, :] for t in range(S)]

        # --- unrolled recurrence: exactly one MXU push per step.
        #     z = h_{t-1} @ [Whh^T | Wfc^T]; aligned lanes [0:H) feed tanh (critical
        #     path), lanes [H:H+O) are the previous step's FC output. ---
        h = jnp.tanh(xp_t[0])                                   # h_0 (h_{-1} = 0)
        for t in range(1, S):
            z = jnp.dot(h, w_cat, preferred_element_type=jnp.float32)   # (B, H+O)
            out_ref[:, (t - 1) * O:t * O] = (z[:, H:] + bfc).astype(out_ref.dtype)
            h = jnp.tanh(z[:, :H] + xp_t[t])
        # trailing push for the final step's FC output
        z = jnp.dot(h, w_cat, preferred_element_type=jnp.float32)
        out_ref[:, (S - 1) * O:S * O] = (z[:, H:] + bfc).astype(out_ref.dtype)

    return kernel


def model_forward(x, emb_w, w_ih, w_hh, b_ih, b_hh, w_fc, b_fc):
    """x: (B, S, V) float32 one-hot. Returns (B, S, O) float32."""
    B, S, V = x.shape
    H = w_hh.shape[0]
    O = w_fc.shape[0]

    params = pack_params(emb_w, w_ih, w_hh, b_ih, b_hh, w_fc, b_fc)  # cacheable
    # Time-major, flattened rows (row r = s*B + b) so per-step slices are contiguous.
    x_flat = jnp.transpose(x, (1, 0, 2)).reshape(S * B, V).astype(jnp.float32)

    vmem = pl.BlockSpec(memory_space=pltpu.MemorySpace.VMEM)
    out_flat = pl.pallas_call(
        make_kernel(B, S, V, H, O),
        out_shape=jax.ShapeDtypeStruct((B, S * O), jnp.float32),
        in_specs=[vmem, vmem],
        out_specs=vmem,
        # NOTE: gridless single-core launch on purpose -- total footprint is <64 KiB
        # and per-grid-step overhead (~0.35 us) would dominate.  If batch grows to
        # hundreds of rows, add grid=(B // tb,) over batch with
        # compiler_params=pltpu.CompilerParams(dimension_semantics=("parallel",))
        # to use v7x's second TensorCore.
    )(x_flat, params)
    return out_flat.reshape(B, S, O)


def reference_forward(x, emb_w, w_ih, w_hh, b_ih, b_hh, w_fc, b_fc):
    idx = jnp.argmax(x, axis=2)
    e = emb_w[idx]                                   # (B, S, embedding_dim)
    B, S, _ = e.shape
    H = w_hh.shape[0]

    def step(h, xt):
        h_new = jnp.tanh(xt @ w_ih.T + b_ih + h @ w_hh.T + b_hh)
        return h_new, h_new

    _, hs = lax.scan(step, jnp.zeros((B, H), jnp.float32),
                     jnp.transpose(e, (1, 0, 2)))    # (S, B, H)
    hs = jnp.transpose(hs, (1, 0, 2))                # (B, S, H)
    return hs @ w_fc.T + b_fc


if __name__ == "__main__":
    # Small shapes consistent with the module: vocab/embedding_size V = 16,
    # input_size = V, hidden_dim = 32, output_size = V, batch = 2, seq = 8.
    B, S, V, H, O = 2, 8, 16, 32, 16

    key = jax.random.PRNGKey(0)
    k_idx, k_emb, k_wih, k_whh, k_bih, k_bhh, k_wfc, k_bfc = jax.random.split(key, 8)

    # One-hot input (like one_hot_encode of a char sequence).
    idx = jax.random.randint(k_idx, (B, S), 0, V)
    x = jax.nn.one_hot(idx, V, dtype=jnp.float32)    # (B, S, V)

    # Deterministic parameter init (shapes match nn.Embedding / nn.RNN / nn.Linear).
    emb_w = jax.random.normal(k_emb, (V, V), jnp.float32) * 0.5
    w_ih = jax.random.normal(k_wih, (H, V), jnp.float32) * 0.2   # weight_ih_l0
    w_hh = jax.random.normal(k_whh, (H, H), jnp.float32) * 0.2   # weight_hh_l0
    b_ih = jax.random.normal(k_bih, (H,), jnp.float32) * 0.1
    b_hh = jax.random.normal(k_bhh, (H,), jnp.float32) * 0.1
    w_fc = jax.random.normal(k_wfc, (O, H), jnp.float32) * 0.2   # fc.weight
    b_fc = jax.random.normal(k_bfc, (O,), jnp.float32) * 0.1

    out = model_forward(x, emb_w, w_ih, w_hh, b_ih, b_hh, w_fc, b_fc)
    out = jax.block_until_ready(out)

    ref = reference_forward(x, emb_w, w_ih, w_hh, b_ih, b_hh, w_fc, b_fc)
    assert out.shape == (B, S, O)
    assert jnp.allclose(out, ref, atol=1e-4, rtol=1e-4), "mismatch vs reference"

    print("KERNEL_OK")
</pallas_src>

<mosaic_0001>
module attributes {stable_mosaic.version = 11 : i64} {
  func.func @kernel(%arg0: memref<16x16xf32, #tpu.memory_space<vmem>>, %arg1: memref<56x128xf32, #tpu.memory_space<vmem>>, %arg2: memref<2x128xf32, #tpu.memory_space<vmem>>) attributes {dimension_semantics = [], scalar_prefetch = 0 : i64, scratch_operands = 0 : i64, tpu.core_type = #tpu.core_type<tc>} {
    %c0 = arith.constant 0 : index
    %c0_0 = arith.constant 0 : index
    %0 = vector.load %arg0[%c0, %c0_0] : memref<16x16xf32, #tpu.memory_space<vmem>>, vector<16x16xf32>
    %1 = tpu.iota {dimensions = array<i32: 1>} : vector<16x16xi32>
    %cst = arith.constant dense<0xFF800000> : vector<16xf32>
    %2 = vector.multi_reduction <maximumf>, %0, %cst [1] : vector<16x16xf32> to vector<16xf32>
    %3 = vector.shape_cast %2 : vector<16xf32> to vector<16x1xf32>
    %4 = vector.broadcast %3 : vector<16x1xf32> to vector<16x16xf32>
    %5 = arith.cmpf oeq, %0, %4 : vector<16x16xf32>
    %c16_i32 = arith.constant 16 : i32
    %6 = vector.broadcast %c16_i32 : i32 to vector<16x16xi32>
    %7 = arith.select %5, %1, %6 : vector<16x16xi1>, vector<16x16xi32>
    %cst_1 = arith.constant dense<2147483647> : vector<16xi32>
    %8 = vector.multi_reduction <minsi>, %7, %cst_1 [1] : vector<16x16xi32> to vector<16xi32>
    %9 = vector.shape_cast %8 : vector<16xi32> to vector<16x1xi32>
    %10 = vector.broadcast %9 : vector<16x1xi32> to vector<16x16xi32>
    %11 = arith.cmpi eq, %1, %10 : vector<16x16xi32>
    %12 = arith.extui %11 : vector<16x16xi1> to vector<16x16xi32>
    %13 = arith.sitofp %12 : vector<16x16xi32> to vector<16x16xf32>
    %c0_2 = arith.constant 0 : index
    %c0_3 = arith.constant 0 : index
    %14 = vector.load %arg1[%c0_2, %c0_3] : memref<56x128xf32, #tpu.memory_space<vmem>>, vector<32x48xf32>
    %c32 = arith.constant 32 : index
    %c0_4 = arith.constant 0 : index
    %15 = vector.load %arg1[%c32, %c0_4] : memref<56x128xf32, #tpu.memory_space<vmem>>, vector<16x32xf32>
    %c48 = arith.constant 48 : index
    %c0_5 = arith.constant 0 : index
    %16 = vector.load %arg1[%c48, %c0_5] : memref<56x128xf32, #tpu.memory_space<vmem>>, vector<1x32xf32>
    %c49 = arith.constant 49 : index
    %c0_6 = arith.constant 0 : index
    %17 = vector.load %arg1[%c49, %c0_6] : memref<56x128xf32, #tpu.memory_space<vmem>>, vector<1x16xf32>
    %cst_7 = arith.constant dense<0.000000e+00> : vector<16x32xf32>
    %18 = tpu.matmul %13, %15, %cst_7 {dimension_numbers = #tpu.dot_dimension_numbers<[1], [0], [0], [1], [0, 0, 1, 1], [], []>} : vector<16x16xf32>, vector<16x32xf32>, vector<16x32xf32> -> vector<16x32xf32>
    %19 = vector.broadcast %16 : vector<1x32xf32> to vector<16x32xf32>
    %20 = arith.addf %18, %19 : vector<16x32xf32>
    %21 = vector.extract_strided_slice %20 {offsets = [0, 0], sizes = [2, 32], strides = [1, 1]} : vector<16x32xf32> to vector<2x32xf32>
    %22 = vector.extract_strided_slice %20 {offsets = [2, 0], sizes = [2, 32], strides = [1, 1]} : vector<16x32xf32> to vector<2x32xf32>
    %23 = vector.extract_strided_slice %20 {offsets = [4, 0], sizes = [2, 32], strides = [1, 1]} : vector<16x32xf32> to vector<2x32xf32>
    %24 = vector.extract_strided_slice %20 {offsets = [6, 0], sizes = [2, 32], strides = [1, 1]} : vector<16x32xf32> to vector<2x32xf32>
    %25 = vector.extract_strided_slice %20 {offsets = [8, 0], sizes = [2, 32], strides = [1, 1]} : vector<16x32xf32> to vector<2x32xf32>
    %26 = vector.extract_strided_slice %20 {offsets = [10, 0], sizes = [2, 32], strides = [1, 1]} : vector<16x32xf32> to vector<2x32xf32>
    %27 = vector.extract_strided_slice %20 {offsets = [12, 0], sizes = [2, 32], strides = [1, 1]} : vector<16x32xf32> to vector<2x32xf32>
    %28 = vector.extract_strided_slice %20 {offsets = [14, 0], sizes = [2, 32], strides = [1, 1]} : vector<16x32xf32> to vector<2x32xf32>
    %29 = math.tanh %21 : vector<2x32xf32>
    %cst_8 = arith.constant dense<0.000000e+00> : vector<2x48xf32>
    %30 = tpu.matmul %29, %14, %cst_8 {dimension_numbers = #tpu.dot_dimension_numbers<[1], [0], [0], [1], [0, 0, 1, 1], [], []>} : vector<2x32xf32>, vector<32x48xf32>, vector<2x48xf32> -> vector<2x48xf32>
    %31 = vector.extract_strided_slice %30 {offsets = [0, 32], sizes = [2, 16], strides = [1, 1]} : vector<2x48xf32> to vector<2x16xf32>
    %32 = vector.broadcast %17 : vector<1x16xf32> to vector<2x16xf32>
    %33 = arith.addf %31, %32 : vector<2x16xf32>
    %c0_9 = arith.constant 0 : index
    %c0_10 = arith.constant 0 : index
    %34 = vector.load %arg2[%c0_9, %c0_10] : memref<2x128xf32, #tpu.memory_space<vmem>>, vector<2x16xf32>
    tpu.vector_store %arg2[%c0_9, %c0_10], %33 {strides = array<i32>} : memref<2x128xf32, #tpu.memory_space<vmem>>, vector<2x16xf32>,
    %35 = vector.extract_strided_slice %30 {offsets = [0, 0], sizes = [2, 32], strides = [1, 1]} : vector<2x48xf32> to vector<2x32xf32>
    %36 = arith.addf %35, %22 : vector<2x32xf32>
    %37 = math.tanh %36 : vector<2x32xf32>
    %cst_11 = arith.constant dense<0.000000e+00> : vector<2x48xf32>
    %38 = tpu.matmul %37, %14, %cst_11 {dimension_numbers = #tpu.dot_dimension_numbers<[1], [0], [0], [1], [0, 0, 1, 1], [], []>} : vector<2x32xf32>, vector<32x48xf32>, vector<2x48xf32> -> vector<2x48xf32>
    %39 = vector.extract_strided_slice %38 {offsets = [0, 32], sizes = [2, 16], strides = [1, 1]} : vector<2x48xf32> to vector<2x16xf32>
    %40 = vector.broadcast %17 : vector<1x16xf32> to vector<2x16xf32>
    %41 = arith.addf %39, %40 : vector<2x16xf32>
    %c0_12 = arith.constant 0 : index
    %c16 = arith.constant 16 : index
    %42 = vector.load %arg2[%c0_12, %c16] : memref<2x128xf32, #tpu.memory_space<vmem>>, vector<2x16xf32>
    tpu.vector_store %arg2[%c0_12, %c16], %41 {strides = array<i32>} : memref<2x128xf32, #tpu.memory_space<vmem>>, vector<2x16xf32>,
    %43 = vector.extract_strided_slice %38 {offsets = [0, 0], sizes = [2, 32], strides = [1, 1]} : vector<2x48xf32> to vector<2x32xf32>
    %44 = arith.addf %43, %23 : vector<2x32xf32>
    %45 = math.tanh %44 : vector<2x32xf32>
    %cst_13 = arith.constant dense<0.000000e+00> : vector<2x48xf32>
    %46 = tpu.matmul %45, %14, %cst_13 {dimension_numbers = #tpu.dot_dimension_numbers<[1], [0], [0], [1], [0, 0, 1, 1], [], []>} : vector<2x32xf32>, vector<32x48xf32>, vector<2x48xf32> -> vector<2x48xf32>
    %47 = vector.extract_strided_slice %46 {offsets = [0, 32], sizes = [2, 16], strides = [1, 1]} : vector<2x48xf32> to vector<2x16xf32>
    %48 = vector.broadcast %17 : vector<1x16xf32> to vector<2x16xf32>
    %49 = arith.addf %47, %48 : vector<2x16xf32>
    %c0_14 = arith.constant 0 : index
    %c32_15 = arith.constant 32 : index
    %50 = vector.load %arg2[%c0_14, %c32_15] : memref<2x128xf32, #tpu.memory_space<vmem>>, vector<2x16xf32>
    tpu.vector_store %arg2[%c0_14, %c32_15], %49 {strides = array<i32>} : memref<2x128xf32, #tpu.memory_space<vmem>>, vector<2x16xf32>,
    %51 = vector.extract_strided_slice %46 {offsets = [0, 0], sizes = [2, 32], strides = [1, 1]} : vector<2x48xf32> to vector<2x32xf32>
    %52 = arith.addf %51, %24 : vector<2x32xf32>
    %53 = math.tanh %52 : vector<2x32xf32>
    %cst_16 = arith.constant dense<0.000000e+00> : vector<2x48xf32>
    %54 = tpu.matmul %53, %14, %cst_16 {dimension_numbers = #tpu.dot_dimension_numbers<[1], [0], [0], [1], [0, 0, 1, 1], [], []>} : vector<2x32xf32>, vector<32x48xf32>, vector<2x48xf32> -> vector<2x48xf32>
    %55 = vector.extract_strided_slice %54 {offsets = [0, 32], sizes = [2, 16], strides = [1, 1]} : vector<2x48xf32> to vector<2x16xf32>
    %56 = vector.broadcast %17 : vector<1x16xf32> to vector<2x16xf32>
    %57 = arith.addf %55, %56 : vector<2x16xf32>
    %c0_17 = arith.constant 0 : index
    %c48_18 = arith.constant 48 : index
    %58 = vector.load %arg2[%c0_17, %c48_18] : memref<2x128xf32, #tpu.memory_space<vmem>>, vector<2x16xf32>
    tpu.vector_store %arg2[%c0_17, %c48_18], %57 {strides = array<i32>} : memref<2x128xf32, #tpu.memory_space<vmem>>, vector<2x16xf32>,
    %59 = vector.extract_strided_slice %54 {offsets = [0, 0], sizes = [2, 32], strides = [1, 1]} : vector<2x48xf32> to vector<2x32xf32>
    %60 = arith.addf %59, %25 : vector<2x32xf32>
    %61 = math.tanh %60 : vector<2x32xf32>
    %cst_19 = arith.constant dense<0.000000e+00> : vector<2x48xf32>
    %62 = tpu.matmul %61, %14, %cst_19 {dimension_numbers = #tpu.dot_dimension_numbers<[1], [0], [0], [1], [0, 0, 1, 1], [], []>} : vector<2x32xf32>, vector<32x48xf32>, vector<2x48xf32> -> vector<2x48xf32>
    %63 = vector.extract_strided_slice %62 {offsets = [0, 32], sizes = [2, 16], strides = [1, 1]} : vector<2x48xf32> to vector<2x16xf32>
    %64 = vector.broadcast %17 : vector<1x16xf32> to vector<2x16xf32>
    %65 = arith.addf %63, %64 : vector<2x16xf32>
    %c0_20 = arith.constant 0 : index
    %c64 = arith.constant 64 : index
    %66 = vector.load %arg2[%c0_20, %c64] : memref<2x128xf32, #tpu.memory_space<vmem>>, vector<2x16xf32>
    tpu.vector_store %arg2[%c0_20, %c64], %65 {strides = array<i32>} : memref<2x128xf32, #tpu.memory_space<vmem>>, vector<2x16xf32>,
    %67 = vector.extract_strided_slice %62 {offsets = [0, 0], sizes = [2, 32], strides = [1, 1]} : vector<2x48xf32> to vector<2x32xf32>
    %68 = arith.addf %67, %26 : vector<2x32xf32>
    %69 = math.tanh %68 : vector<2x32xf32>
    %cst_21 = arith.constant dense<0.000000e+00> : vector<2x48xf32>
    %70 = tpu.matmul %69, %14, %cst_21 {dimension_numbers = #tpu.dot_dimension_numbers<[1], [0], [0], [1], [0, 0, 1, 1], [], []>} : vector<2x32xf32>, vector<32x48xf32>, vector<2x48xf32> -> vector<2x48xf32>
    %71 = vector.extract_strided_slice %70 {offsets = [0, 32], sizes = [2, 16], strides = [1, 1]} : vector<2x48xf32> to vector<2x16xf32>
    %72 = vector.broadcast %17 : vector<1x16xf32> to vector<2x16xf32>
    %73 = arith.addf %71, %72 : vector<2x16xf32>
    %c0_22 = arith.constant 0 : index
    %c80 = arith.constant 80 : index
    %74 = vector.load %arg2[%c0_22, %c80] : memref<2x128xf32, #tpu.memory_space<vmem>>, vector<2x16xf32>
    tpu.vector_store %arg2[%c0_22, %c80], %73 {strides = array<i32>} : memref<2x128xf32, #tpu.memory_space<vmem>>, vector<2x16xf32>,
    %75 = vector.extract_strided_slice %70 {offsets = [0, 0], sizes = [2, 32], strides = [1, 1]} : vector<2x48xf32> to vector<2x32xf32>
    %76 = arith.addf %75, %27 : vector<2x32xf32>
    %77 = math.tanh %76 : vector<2x32xf32>
    %cst_23 = arith.constant dense<0.000000e+00> : vector<2x48xf32>
    %78 = tpu.matmul %77, %14, %cst_23 {dimension_numbers = #tpu.dot_dimension_numbers<[1], [0], [0], [1], [0, 0, 1, 1], [], []>} : vector<2x32xf32>, vector<32x48xf32>, vector<2x48xf32> -> vector<2x48xf32>
    %79 = vector.extract_strided_slice %78 {offsets = [0, 32], sizes = [2, 16], strides = [1, 1]} : vector<2x48xf32> to vector<2x16xf32>
    %80 = vector.broadcast %17 : vector<1x16xf32> to vector<2x16xf32>
    %81 = arith.addf %79, %80 : vector<2x16xf32>
    %c0_24 = arith.constant 0 : index
    %c96 = arith.constant 96 : index
    %82 = vector.load %arg2[%c0_24, %c96] : memref<2x128xf32, #tpu.memory_space<vmem>>, vector<2x16xf32>
    tpu.vector_store %arg2[%c0_24, %c96], %81 {strides = array<i32>} : memref<2x128xf32, #tpu.memory_space<vmem>>, vector<2x16xf32>,
    %83 = vector.extract_strided_slice %78 {offsets = [0, 0], sizes = [2, 32], strides = [1, 1]} : vector<2x48xf32> to vector<2x32xf32>
    %84 = arith.addf %83, %28 : vector<2x32xf32>
    %85 = math.tanh %84 : vector<2x32xf32>
    %cst_25 = arith.constant dense<0.000000e+00> : vector<2x48xf32>
    %86 = tpu.matmul %85, %14, %cst_25 {dimension_numbers = #tpu.dot_dimension_numbers<[1], [0], [0], [1], [0, 0, 1, 1], [], []>} : vector<2x32xf32>, vector<32x48xf32>, vector<2x48xf32> -> vector<2x48xf32>
    %87 = vector.extract_strided_slice %86 {offsets = [0, 32], sizes = [2, 16], strides = [1, 1]} : vector<2x48xf32> to vector<2x16xf32>
    %88 = vector.broadcast %17 : vector<1x16xf32> to vector<2x16xf32>
    %89 = arith.addf %87, %88 : vector<2x16xf32>
    %c0_26 = arith.constant 0 : index
    %c112 = arith.constant 112 : index
    %90 = vector.load %arg2[%c0_26, %c112] : memref<2x128xf32, #tpu.memory_space<vmem>>, vector<2x16xf32>
    tpu.vector_store %arg2[%c0_26, %c112], %89 {strides = array<i32>} : memref<2x128xf32, #tpu.memory_space<vmem>>, vector<2x16xf32>,
    return
  }
}

</mosaic_0001>

<bundles_post_ra>
// kernel: tpu_custom_call.1
= control target key start
LH: loop header
LB: loop body
LE: loop exit
PB: predicated region body
PF: predicated region fallthrough
CT: control target
= control target key end

     0   :  { %7 = vsyncpa [#allocation3], 0  ;;  %s614_s0 = inlined_call_operand.hbm [shape: f32[16,16], index: 0, kind: input, shape index: {}]   ;;  %s615_s1 = inlined_call_operand.hbm [shape: f32[56,128], index: 1, kind: input, shape index: {}]   ;;  %s616_s2 = inlined_call_operand.hbm [shape: f32[2,128], index: 2, kind: output, shape index: {}]  }
   0x1   :  { %8 = vsyncpa [#allocation6], 0 }
   0x2   :  { %9 = vsyncpa [#allocation4], 0  ;;  %s14_s11 = sshll.u32 %s614_s0, 4  ;;  %s543_s12 = smov [#allocation2]   ;;  %s15_s11 = int_to_ptr.hbm [resolvable:$true] %s14_s11 }
   0x3   :  { %s16_s13 = sshll.u32 %s543_s12, 4  ;;  %s27_s16 = sshll.u32 %s615_s1, 4  ;;  %s17_s13 = int_to_ptr.vmem [resolvable:$true] %s16_s13  ;;  %s28_s16 = int_to_ptr.hbm [resolvable:$true] %s27_s16 }
   0x4   :  { %s544_s17 = smov 128   ;;  %s545_s18 = smov 8  }
   0x5   :  { %22 = dma.hbm_to_vmem [thread:$0]  %s15_s11, 256, %s17_s13, [#allocation3], %s544_s17, %s544_s17, %s545_s18  }
   0x6   :  { %s546_s19 = smov [#allocation5]  }
   0x7   :  { %s29_s20 = sshll.u32 %s546_s19, 4  ;;  %s30_s20 = int_to_ptr.vmem [resolvable:$true] %s29_s20 }
   0x8   :  { %35 = dma.hbm_to_vmem [thread:$0]  %s28_s16, 896, %s30_s20, [#allocation6], %s544_s17, %s544_s17, %s545_s18  }
   0x9   :  { %537 = dma.done.wait [#allocation3], 256  }
   0xa   :  { %538 = vsyncadd [#allocation3], 4294967040 }
   0xb   :  { %539 = dma.done.wait [#allocation6], 896  }
   0xc   :  { %540 = vsyncadd [#allocation6], 4294966400  ;;  %vm48_vm0 = vcmask 130048   ;;  %v44_v0 = vld [vmem:[#allocation2] sm:$0xff]  ;;  %v46_v2 = vlaneseq  ;;  %v100_v13 = vld [vmem:[#allocation5 + $0x28] sm:$0xff]  ;;  %v547_v22 = vmov 0.0  }
   0xd   :  { %v49_v1 = vsel %vm48_vm0, %v44_v0, -inf  ;;  %v99_v14 = vld [vmem:[#allocation5 + $0x20] sm:$0xff]  ;;  %124 = vmatpush.msra.mxu0 %v100_v13  ;;  %v45_v15 = vld [vmem:[#allocation2 + $0x8] sm:$0xff]  ;;  %v97_v25 = vld [vmem:[#allocation5 + $0x10] sm:$0xff]  ;;  %s548_s0 = smov 32   ;;  %vm134_vm5 = vcmask 261120  }
   0xe   :  { %50 = vmax.xlane.f32.xlu0 %v49_v1  ;;  %v578_v3 = vand.u32 127, %v46_v2  ;;  %v52_v16 = vsel %vm48_vm0, %v45_v15, -inf  ;;  %v98_v24 = vld [vmem:[#allocation5 + $0x18] sm:$0xff]  ;;  %v96_v26 = vld [vmem:[#allocation5 + $0x8] sm:$0xff]  ;;  %v95_v27 = vld [vmem:[#allocation5] sm:$0xff]  ;;  %s549_s1 = smov 96  }
   0xf   :  { %125 = vmatpush.msra.mxu0 %v99_v14  ;;  %150 = vmatpush.msra.mxu1 %v98_v24  ;;  %v448_v28 = vld [vmem:[#allocation5 + $0x31] ss:$0 sm:$0xff]  ;;  %v447_v34 = vld [vmem:[#allocation5 + $0x30] ss:$0 sm:$0xff]  ;;  %vm168_vm7 = vcmask 123904   ;;  %s550_s21 = smov 112  }
  0x10   :  { %190 = vmatpush.msra.mxu2 %v98_v24  ;;  %224 = vmatpush.msra.mxu3 %v98_v24  ;;  %vm203_vm9 = vcmask 255104   ;;  %vm233_vm10 = vcmask 386304   ;;  %s551_s22 = smov 16   ;;  %vm267_vm11 = vcmask 517504   ;;  %vm299_vm12 = vcmask 648704   ;;  %s552_s23 = smov 48  }
  0x11   :  { %355 = vmatpush.msrb.mxu0 %v98_v24  ;;  %151 = vmatpush.msra.mxu1 %v97_v25  ;;  %vm334_vm13 = vcmask 779904   ;;  %s553_s24 = smov 64   ;;  %vm368_vm14 = vcmask 911104   ;;  %s554_s25 = smov 80   ;;  %vm402_vm15 = vcmask 1042304  }
  0x12   :  { %191 = vmatpush.msra.mxu2 %v97_v25  ;;  %225 = vmatpush.msra.mxu3 %v97_v25  ;;  %s555_s26 = smov [#allocation7]   ;;  %s411_s30 = sshll.u32 %s616_s2, 4  ;;  %s412_s30 = int_to_ptr.hbm [resolvable:$true] %s411_s30 }
  0x13   :  { %356 = vmatpush.msrb.mxu0 %v97_v25  ;;  %152 = vmatpush.msra.mxu1 %v96_v26  ;;  %s409_s27 = sshll.u32 %s555_s26, 4  ;;  %s410_s27 = int_to_ptr.vmem [resolvable:$true] %s409_s27 }
  0x14   :  { %192 = vmatpush.msra.mxu2 %v96_v26  ;;  %226 = vmatpush.msra.mxu3 %v96_v26 }
  0x15   :  { %357 = vmatpush.msrb.mxu0 %v96_v26  ;;  %153 = vmatpush.msra.mxu1 %v95_v27 }
  0x16   :  { %193 = vmatpush.msra.mxu2 %v95_v27  ;;  %227 = vmatpush.msra.mxu3 %v95_v27 }
  0x17   :  { %254 = vmatpush.msrb.mxu1 %v98_v24  ;;  %358 = vmatpush.msrb.mxu0 %v95_v27 }
  0x18   :  { %286 = vmatpush.msrb.mxu2 %v98_v24  ;;  %321 = vmatpush.msrb.mxu3 %v98_v24 }
  0x19   :  { %255 = vmatpush.msrb.mxu1 %v97_v25 }
  0x1a   :  { %287 = vmatpush.msrb.mxu2 %v97_v25  ;;  %322 = vmatpush.msrb.mxu3 %v97_v25 }
  0x1b   :  { %256 = vmatpush.msrb.mxu1 %v96_v26 }
  0x1c   :  { %288 = vmatpush.msrb.mxu2 %v96_v26  ;;  %323 = vmatpush.msrb.mxu3 %v96_v26 }
  0x1d   :  { %257 = vmatpush.msrb.mxu1 %v95_v27 }
  0x1e   :  { %289 = vmatpush.msrb.mxu2 %v95_v27  ;;  %324 = vmatpush.msrb.mxu3 %v95_v27 }
  0x81   :  { %v51_v4 = vpop.xlane.xlu0 %50 }
  0x82   :  { %vm55_vm1 = vcmp.eq.f32.partialorder %v44_v0, %v51_v4 }
  0x83   :  { %v57_v5 = vsel %vm55_vm1, %v578_v3, 16 }
  0x84   :  { %v59_v6 = vsel %vm48_vm0, %v57_v5, 2147483647 }
  0x85   :  { %v61_v7 = vshra.s32 %v59_v6, 16  ;;  %v60_v9 = vand.u32 65535, %v59_v6 }
  0x87   :  { %v63_v8 = vcvt.s32.f32 %v61_v7  ;;  %v62_v11 = vcvt.s32.f32 %v60_v9 }
  0x89   :  { %64 = vmin.xlane.f32.xlu0 %v63_v8 }
  0x9d   :  { %160 = vrot.lane.b32.xlu0 %v448_v28, %s548_s0 }
  0xfc   :  { %v65_v10 = vpop.xlane.xlu0 %64 }
  0xfd   :  { %vm66_vm2 = vcmp.eq.f32.partialorder %v63_v8, %v65_v10  ;;  %v71_v17 = vcvt.f32.s32 %v65_v10 }
  0xfe   :  { %v67_v12 = vsel %vm66_vm2, %v62_v11, inf }
  0xff   :  { %68 = vmin.xlane.f32.xlu1 %v67_v12  ;;  %v72_v19 = vshll.u32 %v71_v17, 16 }
 0x107   :  { %53 = vmax.xlane.f32.xlu1 %v52_v16 }
 0x10f   :  { %v590_v42 = vpop.permute.xlu0 %160 }
 0x172   :  { %v69_v18 = vpop.xlane.xlu1 %68 }
 0x173   :  { %v70_v20 = vcvt.f32.s32 %v69_v18 }
 0x175   :  { %v73_v21 = vadd.s32 %v72_v19, %v70_v20 }
 0x177   :  { %vm89_vm3 = vcmp.eq.s32.totalorder %v578_v3, %v73_v21 }
 0x178   :  { %v422_v23 = vsel %vm89_vm3, 1.0, %v547_v22 }
 0x179   :  { %424 = vmatmul.msk.f32.vlgmr.msra.gmra.mxu0 %vm48_vm0, %v422_v23 }
 0x17a   :  { %v54_v29 = vpop.xlane.xlu1 %53 }
 0x17b   :  { %vm56_vm4 = vcmp.eq.f32.partialorder %v45_v15, %v54_v29 }
 0x17c   :  { %v58_v30 = vsel %vm56_vm4, %v578_v3, 16 }
 0x17d   :  { %v74_v31 = vsel %vm48_vm0, %v58_v30, 2147483647 }
 0x17e   :  { %v76_v32 = vshra.s32 %v74_v31, 16  ;;  %v75_v39 = vand.u32 65535, %v74_v31 }
 0x180   :  { %v78_v33 = vcvt.s32.f32 %v76_v32  ;;  %v77_v40 = vcvt.s32.f32 %v75_v39 }
 0x182   :  { %79 = vmin.xlane.f32.xlu2 %v78_v33 }
 0x1f5   :  { %v80_v38 = vpop.xlane.xlu2 %79 }
 0x1f6   :  { %v127_v35 = vpop.f32.mrf.mxu0  ;;  %vm81_vm6 = vcmp.eq.f32.partialorder %v78_v33, %v80_v38  ;;  %v86_v48 = vcvt.f32.s32 %v80_v38 }
 0x1f7   :  { %v128_v36 = vadd.f32 %v447_v34, %v127_v35  ;;  %v82_v41 = vsel %vm81_vm6, %v77_v40, inf }
 0x1f8   :  { %83 = vmin.xlane.f32.xlu2 %v82_v41  ;;  %v87_v50 = vshll.u32 %v86_v48, 16 }
 0x1f9   :  { %449 = vtanh.f32 %v128_v36  ;;  %v171_v43 = vrot.slane %v128_v36, 2  ;;  %v205_v55 = vrot.slane %v128_v36, 4  ;;  %v235_v61 = vrot.slane %v128_v36, 6 }
 0x1ff   :  { %v450_v37 = vpop.eup %449 }
 0x200   :  { %426 = vmatmul.msk.f32.vlgmr.msra.gmra.mxu1 %vm134_vm5, %v450_v37 }
 0x201   :  { %389 = vmatpush.msra.mxu1 %v98_v24 }
 0x203   :  { %390 = vmatpush.msra.mxu1 %v97_v25 }
 0x205   :  { %391 = vmatpush.msra.mxu1 %v96_v26 }
 0x207   :  { %392 = vmatpush.msra.mxu1 %v95_v27 }
 0x26b   :  { %v84_v51 = vpop.xlane.xlu2 %83 }
 0x26c   :  { %v85_v52 = vcvt.f32.s32 %v84_v51 }
 0x26e   :  { %v88_v53 = vadd.s32 %v87_v50, %v85_v52 }
 0x270   :  { %vm90_vm8 = vcmp.eq.s32.totalorder %v578_v3, %v88_v53 }
 0x271   :  { %v423_v54 = vsel %vm90_vm8, 1.0, %v547_v22 }
 0x272   :  { %425 = vmatmul.msk.f32.gmra.mxu0 %vm48_vm0, %v423_v54 }
 0x27d   :  { %v155_v44 = vpop.f32.mrf.mxu1 }
 0x27e   :  { %v163_v45 = vadd.f32 %v590_v42, %v155_v44  ;;  %v173_v46 = vadd.f32 %v171_v43, %v155_v44 }
 0x280   :  { %451 = vtanh.f32 %v173_v46  ;;  %165 = vrot.lane.b32.xlu1 %v163_v45, %s549_s1 }
 0x286   :  { %v452_v47 = vpop.eup %451 }
 0x287   :  { %427 = vmatmul.msk.f32.vlgmr.msra.gmra.mxu2 %vm134_vm5, %v452_v47 }
 0x2ef   :  { %v130_v2 = vpop.f32.mrf.mxu0 }
 0x2f0   :  { %v131_v3 = vadd.f32 %v447_v34, %v130_v2 }
 0x2f2   :  { %v166_v49 = vpop.permute.xlu1 %165  ;;  %v302_v9 = vrot.slane %v131_v3, 2  ;;  %v336_v15 = vrot.slane %v131_v3, 4  ;;  %v370_v21 = vrot.slane %v131_v3, 6 }
 0x2f3   :  { %169 = vst.msk [vmem:[#allocation7] sm:$0x3] %vm168_vm7, %v166_v49 }
 0x30a   :  { %v195_v56 = vpop.f32.mrf.mxu2 }
 0x30b   :  { %v198_v57 = vadd.f32 %v195_v56, %v590_v42  ;;  %v207_v58 = vadd.f32 %v205_v55, %v195_v56 }
 0x30d   :  { %453 = vtanh.f32 %v207_v58  ;;  %200 = vrot.lane.b32.xlu2 %v198_v57, %s550_s21 }
 0x313   :  { %v454_v59 = vpop.eup %453 }
 0x314   :  { %428 = vmatmul.msk.f32.vlgmr.msra.gmra.mxu3 %vm134_vm5, %v454_v59 }
 0x367   :  { %v201_v60 = vpop.permute.xlu2 %200 }
 0x368   :  { %204 = vst.msk [vmem:[#allocation7] sm:$0x3] %vm203_vm9, %v201_v60 }
 0x397   :  { %v229_v62 = vpop.f32.mrf.mxu3 }
 0x398   :  { %v232_v63 = vadd.f32 %v229_v62, %v590_v42  ;;  %v237_v0 = vadd.f32 %v235_v61, %v229_v62 }
 0x39a   :  { %455 = vtanh.f32 %v237_v0  ;;  %234 = vst.msk [vmem:[#allocation7] sm:$0x3] %vm233_vm10, %v232_v63 }
 0x3a0   :  { %v456_v1 = vpop.eup %455 }
 0x3a1   :  { %429 = vmatmul.msk.f32.vlgmr.msrb.gmra.mxu1 %vm134_vm5, %v456_v1 }
 0x41e   :  { %v259_v4 = vpop.f32.mrf.mxu1 }
 0x41f   :  { %v262_v5 = vadd.f32 %v259_v4, %v590_v42  ;;  %v269_v6 = vadd.f32 %v259_v4, %v131_v3 }
 0x421   :  { %457 = vtanh.f32 %v269_v6  ;;  %264 = vrot.lane.b32.xlu0 %v262_v5, %s551_s22 }
 0x427   :  { %v458_v7 = vpop.eup %457 }
 0x428   :  { %430 = vmatmul.msk.f32.vlgmr.msrb.gmra.mxu2 %vm134_vm5, %v458_v7 }
 0x493   :  { %v265_v8 = vpop.permute.xlu0 %264 }
 0x494   :  { %268 = vst.msk [vmem:[#allocation7] sm:$0x3] %vm267_vm11, %v265_v8 }
 0x4ab   :  { %v291_v10 = vpop.f32.mrf.mxu2 }
 0x4ac   :  { %v294_v11 = vadd.f32 %v291_v10, %v590_v42  ;;  %v304_v12 = vadd.f32 %v302_v9, %v291_v10 }
 0x4ae   :  { %459 = vtanh.f32 %v304_v12  ;;  %296 = vrot.lane.b32.xlu2 %v294_v11, %s548_s0 }
 0x4b4   :  { %v460_v13 = vpop.eup %459 }
 0x4b5   :  { %431 = vmatmul.msk.f32.vlgmr.msrb.gmra.mxu3 %vm134_vm5, %v460_v13 }
 0x508   :  { %v297_v14 = vpop.permute.xlu2 %296 }
 0x509   :  { %300 = vst.msk [vmem:[#allocation7] sm:$0x3] %vm299_vm12, %v297_v14 }
 0x538   :  { %v326_v16 = vpop.f32.mrf.mxu3 }
 0x539   :  { %v329_v17 = vadd.f32 %v326_v16, %v590_v42  ;;  %v338_v18 = vadd.f32 %v336_v15, %v326_v16 }
 0x53b   :  { %461 = vtanh.f32 %v338_v18  ;;  %331 = vrot.lane.b32.xlu1 %v329_v17, %s552_s23 }
 0x541   :  { %v462_v19 = vpop.eup %461 }
 0x542   :  { %432 = vmatmul.msk.f32.vlgmr.msrb.gmra.mxu0 %vm134_vm5, %v462_v19 }
 0x5ad   :  { %v332_v20 = vpop.permute.xlu1 %331 }
 0x5ae   :  { %335 = vst.msk [vmem:[#allocation7] sm:$0x3] %vm334_vm13, %v332_v20 }
 0x5bf   :  { %v360_v22 = vpop.f32.mrf.mxu0 }
 0x5c0   :  { %v363_v23 = vadd.f32 %v360_v22, %v590_v42  ;;  %v372_v24 = vadd.f32 %v370_v21, %v360_v22 }
 0x5c2   :  { %463 = vtanh.f32 %v372_v24  ;;  %365 = vrot.lane.b32.xlu0 %v363_v23, %s553_s24 }
 0x5c8   :  { %v464_v25 = vpop.eup %463 }
 0x5c9   :  { %433 = vmatmul.msk.f32.vlgmr.msra.gmra.mxu1 %vm134_vm5, %v464_v25 }
 0x634   :  { %v366_v26 = vpop.permute.xlu0 %365 }
 0x635   :  { %369 = vst.msk [vmem:[#allocation7] sm:$0x3] %vm368_vm14, %v366_v26 }
 0x646   :  { %v394_v27 = vpop.f32.mrf.mxu1 }
 0x647   :  { %v397_v28 = vadd.f32 %v394_v27, %v590_v42 }
 0x649   :  { %399 = vrot.lane.b32.xlu2 %v397_v28, %s554_s25 }
 0x6a3   :  { %v400_v29 = vpop.permute.xlu2 %399 }
 0x6a4   :  { %403 = vst.msk [vmem:[#allocation7] sm:$0x3] %vm402_vm15, %v400_v29 }
 0x6a5   :  { %414 = dma.vmem_to_hbm [thread:$0]  %s410_s27, 32, %s412_s30, [#allocation4]  }
 0x6a6   :  { %541 = dma.done.wait [#allocation4], 32  }
 0x6a7   :  { %542 = vsyncadd [#allocation4], 4294967264 }
 0x6a8   :  { %419 = vsyncpa [#allocation3], 1 }
 0x6a9   :  { %420 = vsyncpa [#allocation6], 1 }
 0x6aa   :  { %421 = vsyncpa [#allocation4], 1 }

</bundles_post_ra>
